<compile_context>
chip_gen: v5e
topology: v5e:2x2
jax: 0.10.0
libtpu: 0.0.40
codegen_flags: <defaults>
</compile_context>

<pallas_src>
import functools

import numpy as np
import jax
import jax.numpy as jnp
from jax.experimental import pallas as pl
from jax.experimental.pallas import tpu as pltpu

K = 3        # conv kernel size (both conv layers)
L_IN = 10    # required input length: 10 -> conv1 8 -> pool 4 -> conv2 2 -> pool 1 == fc1 in (64*1)
LANE = 128


def _round_up(n, m):
    return ((n + m - 1) // m) * m


def music_cnn_kernel(x_ref, w1_ref, b1_ref, w2_ref, b2_ref,
                     wf1_ref, bf1_ref, wf2_ref, bf2_ref, out_ref):
    # All activations are (features, TB): batch lives on the lane axis -> dense loads/stores.
    x = x_ref[...].astype(jnp.bfloat16)                                  # (10, TB)

    # conv1 + bias + ReLU as one Toeplitz matmul; rows = [even pos | odd pos] x 32 ch
    h1 = jnp.dot(w1_ref[...], x, preferred_element_type=jnp.float32) + b1_ref[...]
    h1 = jnp.maximum(h1, 0.0)                                            # (256, TB) f32

    # MaxPool1d(2): even/odd position blocks are the two sublane halves (8-aligned split)
    p1 = jnp.maximum(h1[:128, :], h1[128:, :])                           # (128, TB) = 4 pos x 32 ch

    # conv2 + bias + ReLU as one im2col matmul; rows = [t0 | t1] x 64 ch
    h2 = jnp.dot(w2_ref[...], p1.astype(jnp.bfloat16),
                 preferred_element_type=jnp.float32) + b2_ref[...]
    h2 = jnp.maximum(h2, 0.0)                                            # (128, TB)

    # MaxPool1d(2) over the two remaining positions -> flattened 64-dim features (channel-major)
    feat = jnp.maximum(h2[:64, :], h2[64:, :])                           # (64, TB)

    # fc1 + ReLU
    f1 = jnp.dot(wf1_ref[...], feat.astype(jnp.bfloat16),
                 preferred_element_type=jnp.float32) + bf1_ref[...]
    f1 = jnp.maximum(f1, 0.0)                                            # (128, TB)

    # fc2 -> dense (2, TB) store
    out_ref[...] = (jnp.dot(wf2_ref[...], f1.astype(jnp.bfloat16),
                            preferred_element_type=jnp.float32) + bf2_ref[...])


def build_fused_weights(params):
    """Fold conv weights into Toeplitz / im2col matrices (host-side numpy, done ONCE)."""
    conv1_w, conv1_b, conv2_w, conv2_b, fc1_w, fc1_b, fc2_w, fc2_b = (
        np.asarray(p, np.float32) for p in params)
    L = L_IN
    L1 = L - (K - 1)            # 8
    P1 = L1 // 2                # 4
    L2 = P1 - (K - 1)           # 2

    # conv1 (32,1,3) -> W1T (L1*32, L); row block j corresponds to output position order[j]
    w1 = conv1_w[:, 0, :].T                                              # (K, 32)
    order = list(range(0, 2 * P1, 2)) + list(range(1, 2 * P1, 2))        # even positions, then odd
    W1T = np.zeros((L1 * 32, L), np.float32)
    for j, t in enumerate(order):
        for k in range(K):
            W1T[j * 32:(j + 1) * 32, t + k] = w1[k]
    b1 = np.tile(conv1_b, L1).reshape(L1 * 32, 1)

    # conv2 (64,32,3) -> W2T (L2*64, P1*32); row block t = conv2 output position t
    W2T = np.zeros((L2 * 64, P1 * 32), np.float32)
    for t in range(L2):
        for k in range(K):
            W2T[t * 64:(t + 1) * 64, (t + k) * 32:(t + k + 1) * 32] = conv2_w[:, :, k]
    b2 = np.tile(conv2_b, L2).reshape(L2 * 64, 1)

    return (jnp.asarray(W1T, jnp.bfloat16), jnp.asarray(b1, jnp.float32),
            jnp.asarray(W2T, jnp.bfloat16), jnp.asarray(b2, jnp.float32),
            jnp.asarray(fc1_w, jnp.bfloat16),                            # (128, 64)
            jnp.asarray(fc1_b.reshape(-1, 1), jnp.float32),
            jnp.asarray(fc2_w, jnp.bfloat16),                            # (2, 128)
            jnp.asarray(fc2_b.reshape(-1, 1), jnp.float32))


def _pick_batch_tile(B):
    # Lane-dense tiles (multiple of 128); prefer >=2 grid steps (v7x has 2 TCs); cap at 1024.
    half = _round_up(max(1, (B + 1) // 2), LANE)
    return max(LANE, min(1024, half))


@functools.partial(jax.jit, static_argnames=("batch_tile",))
def music_cnn_forward(x_ncl, fused, batch_tile=None):
    """x_ncl: (B, 1, 10) float32 (PyTorch NCL layout). Returns (B, 2) logits."""
    B, C, L = x_ncl.shape
    assert C == 1 and L == L_IN, "MusicCNN requires (B, 1, 10) inputs (fc1 = Linear(64*1, 128))"
    W1T, b1, W2T, b2, Wf1, bf1, Wf2, bf2 = fused

    tb = batch_tile if batch_tile is not None else _pick_batch_tile(B)
    B_pad = _round_up(B, tb)
    xt = jnp.transpose(x_ncl.reshape(B, L).astype(jnp.float32))          # (L, B): batch on lanes
    if B_pad != B:
        xt = jnp.pad(xt, ((0, 0), (0, B_pad - B)))

    out_t = pl.pallas_call(
        music_cnn_kernel,
        out_shape=jax.ShapeDtypeStruct((2, B_pad), jnp.float32),
        grid=(B_pad // tb,),
        in_specs=[
            pl.BlockSpec((L, tb), lambda b: (0, b)),
            pl.BlockSpec(W1T.shape, lambda b: (0, 0)),
            pl.BlockSpec(b1.shape, lambda b: (0, 0)),
            pl.BlockSpec(W2T.shape, lambda b: (0, 0)),
            pl.BlockSpec(b2.shape, lambda b: (0, 0)),
            pl.BlockSpec(Wf1.shape, lambda b: (0, 0)),
            pl.BlockSpec(bf1.shape, lambda b: (0, 0)),
            pl.BlockSpec(Wf2.shape, lambda b: (0, 0)),
            pl.BlockSpec(bf2.shape, lambda b: (0, 0)),
        ],
        out_specs=pl.BlockSpec((2, tb), lambda b: (0, b)),
        compiler_params=pltpu.CompilerParams(dimension_semantics=("parallel",)),
    )(xt, W1T, b1, W2T, b2, Wf1, bf1, Wf2, bf2)

    return jnp.transpose(out_t[:, :B])                                   # (B, 2)


def init_params(key):
    """PyTorch-default-style uniform init, in native PyTorch layouts."""
    ks = jax.random.split(key, 8)

    def u(k, shape, fan_in):
        bound = 1.0 / (fan_in ** 0.5)
        return jax.random.uniform(k, shape, jnp.float32, -bound, bound)

    conv1_w = u(ks[0], (32, 1, K), 1 * K)
    conv1_b = u(ks[1], (32,), 1 * K)
    conv2_w = u(ks[2], (64, 32, K), 32 * K)
    conv2_b = u(ks[3], (64,), 32 * K)
    fc1_w = u(ks[4], (128, 64), 64)
    fc1_b = u(ks[5], (128,), 64)
    fc2_w = u(ks[6], (2, 128), 128)
    fc2_b = u(ks[7], (2,), 128)
    return (conv1_w, conv1_b, conv2_w, conv2_b, fc1_w, fc1_b, fc2_w, fc2_b)


def reference_forward(x_ncl, params):
    """Pure-JAX f32 replica of the PyTorch forward semantics."""
    conv1_w, conv1_b, conv2_w, conv2_b, fc1_w, fc1_b, fc2_w, fc2_b = params
    B, _, L = x_ncl.shape
    x = x_ncl[:, 0, :]                                                   # (B, L)
    L1 = L - (K - 1)
    w1 = conv1_w[:, 0, :].T                                              # (K, 32)
    h1 = jnp.stack([x[:, t:t + K] @ w1 for t in range(L1)], axis=1) + conv1_b[None, None, :]
    h1 = jnp.maximum(h1, 0.0)                                            # (B, L1, 32)
    P1 = L1 // 2
    p1 = jnp.maximum(h1[:, 0:2 * P1:2, :], h1[:, 1:2 * P1:2, :])         # (B, P1, 32)
    L2 = P1 - (K - 1)
    w2 = jnp.transpose(conv2_w, (2, 1, 0))                               # (K, 32, 64)
    h2 = jnp.stack([sum(p1[:, t + k, :] @ w2[k] for k in range(K)) for t in range(L2)],
                   axis=1) + conv2_b[None, None, :]
    h2 = jnp.maximum(h2, 0.0)                                            # (B, L2, 64)
    P2 = L2 // 2
    p2 = jnp.max(h2[:, :2 * P2, :].reshape(B, P2, 2, 64), axis=2)        # (B, P2, 64)
    flat = jnp.transpose(p2, (0, 2, 1)).reshape(B, -1)                   # PyTorch channel-major flatten
    f1 = jnp.maximum(flat @ fc1_w.T + fc1_b[None, :], 0.0)
    return f1 @ fc2_w.T + fc2_b[None, :]


if __name__ == "__main__":
    key = jax.random.PRNGKey(0)
    pkey, xkey, xkey2 = jax.random.split(key, 3)
    params = init_params(pkey)
    fused = build_fused_weights(params)      # folded once, reused across calls

    # Small primary check (batch=2): single lane-dense tile of 128 (batch padded, then sliced).
    B = 2
    x = jax.random.normal(xkey, (B, 1, L_IN), jnp.float32)
    out = jax.block_until_ready(music_cnn_forward(x, fused))
    ref = reference_forward(x, params)
    assert out.shape == (B, 2)
    # bf16 matmul operands (f32 accumulation) -> tolerance loosened vs. pure-f32 reference.
    assert bool(jnp.allclose(out, ref, atol=5e-2, rtol=5e-2)), (out, ref)

    # Secondary check exercising multiple grid steps + batch padding.
    B2 = 260
    x2 = jax.random.normal(xkey2, (B2, 1, L_IN), jnp.float32)
    out2 = jax.block_until_ready(music_cnn_forward(x2, fused, batch_tile=128))
    ref2 = reference_forward(x2, params)
    assert out2.shape == (B2, 2)
    assert bool(jnp.allclose(out2, ref2, atol=5e-2, rtol=5e-2))

    print("KERNEL_OK")
</pallas_src>

<mosaic_0001>
module attributes {stable_mosaic.version = 11 : i64} {
  func.func @music_cnn_kernel(%arg0: i32, %arg1: memref<10x128xf32, #tpu.memory_space<vmem>>, %arg2: memref<256x10xbf16, #tpu.memory_space<vmem>>, %arg3: memref<256x1xf32, #tpu.memory_space<vmem>>, %arg4: memref<128x128xbf16, #tpu.memory_space<vmem>>, %arg5: memref<128x1xf32, #tpu.memory_space<vmem>>, %arg6: memref<128x64xbf16, #tpu.memory_space<vmem>>, %arg7: memref<128x1xf32, #tpu.memory_space<vmem>>, %arg8: memref<2x128xbf16, #tpu.memory_space<vmem>>, %arg9: memref<2x1xf32, #tpu.memory_space<vmem>>, %arg10: memref<2x128xf32, #tpu.memory_space<vmem>>) attributes {dimension_semantics = [#tpu.dimension_semantics<parallel>], iteration_bounds = array<i64: 1>, scalar_prefetch = 0 : i64, scratch_operands = 0 : i64, tpu.core_type = #tpu.core_type<tc>, window_params = [{transform_indices = @transform_0, window_bounds = array<i64: 10, 128>}, {pipeline_mode = #tpu.pipeline_mode<synchronous>, transform_indices = @transform_1, window_bounds = array<i64: 256, 10>}, {pipeline_mode = #tpu.pipeline_mode<synchronous>, transform_indices = @transform_2, window_bounds = array<i64: 256, 1>}, {pipeline_mode = #tpu.pipeline_mode<synchronous>, transform_indices = @transform_3, window_bounds = array<i64: 128, 128>}, {pipeline_mode = #tpu.pipeline_mode<synchronous>, transform_indices = @transform_4, window_bounds = array<i64: 128, 1>}, {pipeline_mode = #tpu.pipeline_mode<synchronous>, transform_indices = @transform_5, window_bounds = array<i64: 128, 64>}, {pipeline_mode = #tpu.pipeline_mode<synchronous>, transform_indices = @transform_6, window_bounds = array<i64: 128, 1>}, {pipeline_mode = #tpu.pipeline_mode<synchronous>, transform_indices = @transform_7, window_bounds = array<i64: 2, 128>}, {pipeline_mode = #tpu.pipeline_mode<synchronous>, transform_indices = @transform_8, window_bounds = array<i64: 2, 1>}, {transform_indices = @transform_9, window_bounds = array<i64: 2, 128>}]} {
    %c0 = arith.constant 0 : index
    %c0_0 = arith.constant 0 : index
    %0 = vector.load %arg1[%c0, %c0_0] : memref<10x128xf32, #tpu.memory_space<vmem>>, vector<10x128xf32>
    %1 = arith.truncf %0 : vector<10x128xf32> to vector<10x128xbf16>
    %c0_1 = arith.constant 0 : index
    %c0_2 = arith.constant 0 : index
    %2 = vector.load %arg2[%c0_1, %c0_2] : memref<256x10xbf16, #tpu.memory_space<vmem>>, vector<256x10xbf16>
    %cst = arith.constant dense<0.000000e+00> : vector<256x128xf32>
    %3 = tpu.matmul %2, %1, %cst {dimension_numbers = #tpu.dot_dimension_numbers<[1], [0], [0], [1], [0, 0, 1, 1], [], []>} : vector<256x10xbf16>, vector<10x128xbf16>, vector<256x128xf32> -> vector<256x128xf32>
    %c0_3 = arith.constant 0 : index
    %c0_4 = arith.constant 0 : index
    %4 = vector.load %arg3[%c0_3, %c0_4] : memref<256x1xf32, #tpu.memory_space<vmem>>, vector<256x1xf32>
    %5 = vector.broadcast %4 : vector<256x1xf32> to vector<256x128xf32>
    %6 = arith.addf %3, %5 : vector<256x128xf32>
    %cst_5 = arith.constant 0.000000e+00 : f32
    %7 = vector.broadcast %cst_5 : f32 to vector<256x128xf32>
    %8 = arith.maximumf %6, %7 : vector<256x128xf32>
    %9 = vector.extract_strided_slice %8 {offsets = [0, 0], sizes = [128, 128], strides = [1, 1]} : vector<256x128xf32> to vector<128x128xf32>
    %10 = vector.extract_strided_slice %8 {offsets = [128, 0], sizes = [128, 128], strides = [1, 1]} : vector<256x128xf32> to vector<128x128xf32>
    %11 = arith.maximumf %9, %10 : vector<128x128xf32>
    %c0_6 = arith.constant 0 : index
    %c0_7 = arith.constant 0 : index
    %12 = vector.load %arg4[%c0_6, %c0_7] : memref<128x128xbf16, #tpu.memory_space<vmem>>, vector<128x128xbf16>
    %13 = arith.truncf %11 : vector<128x128xf32> to vector<128x128xbf16>
    %cst_8 = arith.constant dense<0.000000e+00> : vector<128x128xf32>
    %14 = tpu.matmul %12, %13, %cst_8 {dimension_numbers = #tpu.dot_dimension_numbers<[1], [0], [0], [1], [0, 0, 1, 1], [], []>} : vector<128x128xbf16>, vector<128x128xbf16>, vector<128x128xf32> -> vector<128x128xf32>
    %c0_9 = arith.constant 0 : index
    %c0_10 = arith.constant 0 : index
    %15 = vector.load %arg5[%c0_9, %c0_10] : memref<128x1xf32, #tpu.memory_space<vmem>>, vector<128x1xf32>
    %16 = vector.broadcast %15 : vector<128x1xf32> to vector<128x128xf32>
    %17 = arith.addf %14, %16 : vector<128x128xf32>
    %cst_11 = arith.constant 0.000000e+00 : f32
    %18 = vector.broadcast %cst_11 : f32 to vector<128x128xf32>
    %19 = arith.maximumf %17, %18 : vector<128x128xf32>
    %20 = vector.extract_strided_slice %19 {offsets = [0, 0], sizes = [64, 128], strides = [1, 1]} : vector<128x128xf32> to vector<64x128xf32>
    %21 = vector.extract_strided_slice %19 {offsets = [64, 0], sizes = [64, 128], strides = [1, 1]} : vector<128x128xf32> to vector<64x128xf32>
    %22 = arith.maximumf %20, %21 : vector<64x128xf32>
    %c0_12 = arith.constant 0 : index
    %c0_13 = arith.constant 0 : index
    %23 = vector.load %arg6[%c0_12, %c0_13] : memref<128x64xbf16, #tpu.memory_space<vmem>>, vector<128x64xbf16>
    %24 = arith.truncf %22 : vector<64x128xf32> to vector<64x128xbf16>
    %cst_14 = arith.constant dense<0.000000e+00> : vector<128x128xf32>
    %25 = tpu.matmul %23, %24, %cst_14 {dimension_numbers = #tpu.dot_dimension_numbers<[1], [0], [0], [1], [0, 0, 1, 1], [], []>} : vector<128x64xbf16>, vector<64x128xbf16>, vector<128x128xf32> -> vector<128x128xf32>
    %c0_15 = arith.constant 0 : index
    %c0_16 = arith.constant 0 : index
    %26 = vector.load %arg7[%c0_15, %c0_16] : memref<128x1xf32, #tpu.memory_space<vmem>>, vector<128x1xf32>
    %27 = vector.broadcast %26 : vector<128x1xf32> to vector<128x128xf32>
    %28 = arith.addf %25, %27 : vector<128x128xf32>
    %cst_17 = arith.constant 0.000000e+00 : f32
    %29 = vector.broadcast %cst_17 : f32 to vector<128x128xf32>
    %30 = arith.maximumf %28, %29 : vector<128x128xf32>
    %c0_18 = arith.constant 0 : index
    %c0_19 = arith.constant 0 : index
    %31 = vector.load %arg8[%c0_18, %c0_19] : memref<2x128xbf16, #tpu.memory_space<vmem>>, vector<2x128xbf16>
    %32 = arith.truncf %30 : vector<128x128xf32> to vector<128x128xbf16>
    %cst_20 = arith.constant dense<0.000000e+00> : vector<2x128xf32>
    %33 = tpu.matmul %31, %32, %cst_20 {dimension_numbers = #tpu.dot_dimension_numbers<[1], [0], [0], [1], [0, 0, 1, 1], [], []>} : vector<2x128xbf16>, vector<128x128xbf16>, vector<2x128xf32> -> vector<2x128xf32>
    %c0_21 = arith.constant 0 : index
    %c0_22 = arith.constant 0 : index
    %34 = vector.load %arg9[%c0_21, %c0_22] : memref<2x1xf32, #tpu.memory_space<vmem>>, vector<2x1xf32>
    %35 = vector.broadcast %34 : vector<2x1xf32> to vector<2x128xf32>
    %36 = arith.addf %33, %35 : vector<2x128xf32>
    %c0_23 = arith.constant 0 : index
    %c0_24 = arith.constant 0 : index
    %37 = vector.load %arg10[%c0_23, %c0_24] : memref<2x128xf32, #tpu.memory_space<vmem>>, vector<2x128xf32>
    tpu.vector_store %arg10[%c0_23, %c0_24], %36 {strides = array<i32>} : memref<2x128xf32, #tpu.memory_space<vmem>>, vector<2x128xf32>,
    return
  }
  func.func @transform_0(%arg0: i32) -> (i32, i32) {
    %c0_i32 = arith.constant 0 : i32
    %c0_i32_0 = arith.constant 0 : i32
    return %c0_i32, %arg0 : i32, i32
  }
  func.func @transform_1(%arg0: i32) -> (i32, i32) {
    %c0_i32 = arith.constant 0 : i32
    %c0_i32_0 = arith.constant 0 : i32
    %c0_i32_1 = arith.constant 0 : i32
    return %c0_i32, %c0_i32_0 : i32, i32
  }
  func.func @transform_2(%arg0: i32) -> (i32, i32) {
    %c0_i32 = arith.constant 0 : i32
    %c0_i32_0 = arith.constant 0 : i32
    %c0_i32_1 = arith.constant 0 : i32
    return %c0_i32, %c0_i32_0 : i32, i32
  }
  func.func @transform_3(%arg0: i32) -> (i32, i32) {
    %c0_i32 = arith.constant 0 : i32
    %c0_i32_0 = arith.constant 0 : i32
    %c0_i32_1 = arith.constant 0 : i32
    return %c0_i32, %c0_i32_0 : i32, i32
  }
  func.func @transform_4(%arg0: i32) -> (i32, i32) {
    %c0_i32 = arith.constant 0 : i32
    %c0_i32_0 = arith.constant 0 : i32
    %c0_i32_1 = arith.constant 0 : i32
    return %c0_i32, %c0_i32_0 : i32, i32
  }
  func.func @transform_5(%arg0: i32) -> (i32, i32) {
    %c0_i32 = arith.constant 0 : i32
    %c0_i32_0 = arith.constant 0 : i32
    %c0_i32_1 = arith.constant 0 : i32
    return %c0_i32, %c0_i32_0 : i32, i32
  }
  func.func @transform_6(%arg0: i32) -> (i32, i32) {
    %c0_i32 = arith.constant 0 : i32
    %c0_i32_0 = arith.constant 0 : i32
    %c0_i32_1 = arith.constant 0 : i32
    return %c0_i32, %c0_i32_0 : i32, i32
  }
  func.func @transform_7(%arg0: i32) -> (i32, i32) {
    %c0_i32 = arith.constant 0 : i32
    %c0_i32_0 = arith.constant 0 : i32
    %c0_i32_1 = arith.constant 0 : i32
    return %c0_i32, %c0_i32_0 : i32, i32
  }
  func.func @transform_8(%arg0: i32) -> (i32, i32) {
    %c0_i32 = arith.constant 0 : i32
    %c0_i32_0 = arith.constant 0 : i32
    %c0_i32_1 = arith.constant 0 : i32
    return %c0_i32, %c0_i32_0 : i32, i32
  }
  func.func @transform_9(%arg0: i32) -> (i32, i32) {
    %c0_i32 = arith.constant 0 : i32
    %c0_i32_0 = arith.constant 0 : i32
    return %c0_i32, %arg0 : i32, i32
  }
}

</mosaic_0001>

<bundles_post_ra>
// kernel: music_cnn_forward.1
= control target key start
LH: loop header
LB: loop body
LE: loop exit
PB: predicated region body
PF: predicated region fallthrough
CT: control target
= control target key end

     0   :  { %v1239_v0 = vmov 0   ;;  %vm389_vm0 = vcmask 1044480   ;;  %vm340_vm1 = vcmask 80896   ;;  %vm927_vm2 = vcmask 523264   ;;  %s1710_s2 = inlined_call_operand.vmem [shape: f32[256,1], index: 2, kind: input, shape index: {}]   ;;  %s1711_s0 = inlined_call_operand.vmem [shape: f32[10,128], index: 0, kind: input, shape index: {}]   ;;  %s1712_s1 = inlined_call_operand.vmem [shape: bf16[256,10], index: 1, kind: input, shape index: {}]   ;;  %s1713_s4 = inlined_call_operand.vmem [shape: f32[128,1], index: 4, kind: input, shape index: {}]   ;;  %s1714_s6 = inlined_call_operand.vmem [shape: f32[128,1], index: 6, kind: input, shape index: {}]   ;;  %s1715_s8 = inlined_call_operand.vmem [shape: f32[2,1], index: 8, kind: input, shape index: {}]   ;;  %s1716_s3 = inlined_call_operand.vmem [shape: bf16[128,128], index: 3, kind: input, shape index: {}]   ;;  %s1717_s5 = inlined_call_operand.vmem [shape: bf16[128,64], index: 5, kind: input, shape index: {}]   ;;  %s1718_s7 = inlined_call_operand.vmem [shape: bf16[2,128], index: 7, kind: input, shape index: {}]   ;;  %s1719_s9 = inlined_call_operand.vmem [shape: f32[2,128], index: 9, kind: output, shape index: {}]  }
   0x1   :  { %1238 = vset.pattern.permute.xlu2 %v1239_v0  ;;  %1237 = vset.pattern.permute.xlu1 %v1239_v0  ;;  %v98_v1 = vld [vmem:[%s1710_s2 + $0xf0] sm:$0xff]  ;;  %v80_v3 = vld [vmem:[%s1710_s2 + $0x60] sm:$0xff]  ;;  %v34_v5 = vld [vmem:[%s1711_s0 + $0x8] sm:$0x3] }
   0x2   :  { %v82_v2 = vld [vmem:[%s1710_s2 + $0x70] sm:$0xff]  ;;  %1236 = vset.pattern.permute.xlu0 %v1239_v0  ;;  %252 = vperm.xlu1 %1237, %v98_v1   ;;  %v33_v4 = vld [vmem:[%s1711_s0] sm:$0xff]  ;;  %v1211_v9 = vld [vmem:[%s1712_s1 + $0x48] sm:$0xff] }
   0x3   :  { %172 = vperm.xlu0 %1236, %v82_v2   ;;  %162 = vperm.xlu2 %1238, %v80_v3   ;;  %v35_v6 = vpack.c.bf16 %v34_v5, %v33_v4  ;;  %v1202_v8 = vld [vmem:[%s1712_s1] sm:$0xff]  ;;  %v99_v10 = vld [vmem:[%s1710_s2 + $0xf8] sm:$0xff]  ;;  %v81_v12 = vld [vmem:[%s1710_s2 + $0x68] sm:$0xff] }
   0x4   :  { %v83_v11 = vld [vmem:[%s1710_s2 + $0x78] sm:$0xff]  ;;  %v97_v13 = vld [vmem:[%s1710_s2 + $0xe8] sm:$0xff]  ;;  %v96_v14 = vld [vmem:[%s1710_s2 + $0xe0] sm:$0xff] }
   0x5   :  { %v391_v7 = vsel %vm389_vm0, %v35_v6, 0  ;;  %v78_v15 = vld [vmem:[%s1710_s2 + $0x50] sm:$0xff]  ;;  %v1203_v16 = vld [vmem:[%s1712_s1 + $0x8] sm:$0xff]  ;;  %v79_v19 = vld [vmem:[%s1710_s2 + $0x58] sm:$0xff] }
   0x6   :  { %400 = vmatpush.bf16.msra.mxu0 %v391_v7  ;;  %1234 = vmatpush.bf16.msra.mxu3 %v391_v7  ;;  %v1212_v17 = vld [vmem:[%s1712_s1 + $0x50] sm:$0xff]  ;;  %v95_v20 = vld [vmem:[%s1710_s2 + $0xd8] sm:$0xff]  ;;  %v77_v21 = vld [vmem:[%s1710_s2 + $0x48] sm:$0xff] }
   0x7   :  { %v94_v18 = vld [vmem:[%s1710_s2 + $0xd0] sm:$0xff]  ;;  %v92_v22 = vld [vmem:[%s1710_s2 + $0xc0] sm:$0xff]  ;;  %v1213_v25 = vld [vmem:[%s1712_s1 + $0x58] sm:$0xff] }
   0x8   :  { %v76_v23 = vld [vmem:[%s1710_s2 + $0x40] sm:$0xff]  ;;  %v1204_v24 = vld [vmem:[%s1712_s1 + $0x10] sm:$0xff]  ;;  %v93_v27 = vld [vmem:[%s1710_s2 + $0xc8] sm:$0xff] }
   0x9   :  { %1114 = vmatmul.msk.bf16.vlgmr.msra.gmra.mxu0 %vm340_vm1, %v1202_v8  ;;  %1123 = vmatmul.msk.bf16.vlgmr.msra.gmra.mxu3 %vm340_vm1, %v1211_v9  ;;  %v74_v26 = vld [vmem:[%s1710_s2 + $0x30] sm:$0xff]  ;;  %v75_v28 = vld [vmem:[%s1710_s2 + $0x38] sm:$0xff]  ;;  %v72_v31 = vld [vmem:[%s1710_s2 + $0x20] sm:$0xff] }
   0xa   :  { %257 = vperm.xlu1 %1237, %v99_v10   ;;  %v91_v29 = vld [vmem:[%s1710_s2 + $0xb8] sm:$0xff]  ;;  %v90_v30 = vld [vmem:[%s1710_s2 + $0xb0] sm:$0xff]  ;;  %v1214_v33 = vld [vmem:[%s1712_s1 + $0x60] sm:$0xff] }
   0xb   :  { %177 = vperm.xlu0 %1236, %v83_v11   ;;  %167 = vperm.xlu2 %1238, %v81_v12   ;;  %v1205_v32 = vld [vmem:[%s1712_s1 + $0x18] sm:$0xff]  ;;  %v88_v34 = vld [vmem:[%s1710_s2 + $0xa0] sm:$0xff]  ;;  %v73_v35 = vld [vmem:[%s1710_s2 + $0x28] sm:$0xff] }
   0xc   :  { %v89_v36 = vld [vmem:[%s1710_s2 + $0xa8] sm:$0xff]  ;;  %v71_v37 = vld [vmem:[%s1710_s2 + $0x18] sm:$0xff]  ;;  %v86_v38 = vld [vmem:[%s1710_s2 + $0x90] sm:$0xff] }
   0xd   :  { %v70_v39 = vld [vmem:[%s1710_s2 + $0x10] sm:$0xff]  ;;  %v1206_v40 = vld [vmem:[%s1712_s1 + $0x20] sm:$0xff]  ;;  %v1215_v41 = vld [vmem:[%s1712_s1 + $0x68] sm:$0xff] }
   0xe   :  { %v68_v42 = vld [vmem:[%s1710_s2] sm:$0xff]  ;;  %v87_v43 = vld [vmem:[%s1710_s2 + $0x98] sm:$0xff]  ;;  %v69_v44 = vld [vmem:[%s1710_s2 + $0x8] sm:$0xff] }
   0xf   :  { %v85_v45 = vld [vmem:[%s1710_s2 + $0x88] sm:$0xff]  ;;  %v84_v46 = vld [vmem:[%s1710_s2 + $0x80] sm:$0xff]  ;;  %v560_v47 = vld [vmem:[%s1713_s4 + $0x30] sm:$0xff] }
  0x10   :  { %v1207_v48 = vld [vmem:[%s1712_s1 + $0x28] sm:$0xff]  ;;  %v1216_v49 = vld [vmem:[%s1712_s1 + $0x70] sm:$0xff]  ;;  %v561_v51 = vld [vmem:[%s1713_s4 + $0x38] sm:$0xff] }
  0x11   :  { %v568_v50 = vld [vmem:[%s1713_s4 + $0x70] sm:$0xff]  ;;  %v569_v52 = vld [vmem:[%s1713_s4 + $0x78] sm:$0xff]  ;;  %v559_v53 = vld [vmem:[%s1713_s4 + $0x28] sm:$0xff] }
  0x12   :  { %247 = vperm.xlu1 %1237, %v97_v13   ;;  %v558_v54 = vld [vmem:[%s1713_s4 + $0x20] sm:$0xff]  ;;  %v1208_v57 = vld [vmem:[%s1712_s1 + $0x30] sm:$0xff]  ;;  %v1217_v58 = vld [vmem:[%s1712_s1 + $0x78] sm:$0xff] }
  0x13   :  { %242 = vperm.xlu0 %1236, %v96_v14   ;;  %152 = vperm.xlu2 %1238, %v78_v15   ;;  %v566_v55 = vld [vmem:[%s1713_s4 + $0x60] sm:$0xff]  ;;  %v556_v59 = vld [vmem:[%s1713_s4 + $0x10] sm:$0xff]  ;;  %v567_v60 = vld [vmem:[%s1713_s4 + $0x68] sm:$0xff] }
  0x14   :  { %v557_v61 = vld [vmem:[%s1713_s4 + $0x18] sm:$0xff]  ;;  %v564_v0 = vld [vmem:[%s1713_s4 + $0x50] sm:$0xff]  ;;  %v554_v1 = vld [vmem:[%s1713_s4] sm:$0xff] }
  0x15   :  { %v565_v63 = vld [vmem:[%s1713_s4 + $0x58] sm:$0xff]  ;;  %v562_v6 = vld [vmem:[%s1713_s4 + $0x40] sm:$0xff]  ;;  %v555_v7 = vld [vmem:[%s1713_s4 + $0x8] sm:$0xff] }
  0x16   :  { %v1209_v5 = vld [vmem:[%s1712_s1 + $0x38] sm:$0xff]  ;;  %v563_v8 = vld [vmem:[%s1713_s4 + $0x48] sm:$0xff]  ;;  %v805_v13 = vld [vmem:[%s1714_s6 + $0x70] sm:$0xff] }
  0x17   :  { %v806_v12 = vld [vmem:[%s1714_s6 + $0x78] sm:$0xff]  ;;  %v803_v14 = vld [vmem:[%s1714_s6 + $0x60] sm:$0xff] }
  0x19   :  { %1115 = vmatmul.msk.bf16.gmra.mxu0 %vm340_vm1, %v1203_v16  ;;  %1124 = vmatmul.msk.bf16.gmra.mxu3 %vm340_vm1, %v1212_v17  ;;  %v1210_v17 = vld [vmem:[%s1712_s1 + $0x40] sm:$0xff] }
  0x1a   :  { %232 = vperm.xlu1 %1237, %v94_v18  }
  0x1b   :  { %157 = vperm.xlu0 %1236, %v79_v19   ;;  %237 = vperm.xlu2 %1238, %v95_v20   ;;  %v801_v19 = vld [vmem:[%s1714_s6 + $0x50] sm:$0xff]  ;;  %v804_v20 = vld [vmem:[%s1714_s6 + $0x68] sm:$0xff] }
  0x22   :  { %147 = vperm.xlu1 %1237, %v77_v21   ;;  %v802_v21 = vld [vmem:[%s1714_s6 + $0x58] sm:$0xff] }
  0x23   :  { %222 = vperm.xlu2 %1238, %v92_v22   ;;  %142 = vperm.xlu0 %1236, %v76_v23  }
  0x29   :  { %1116 = vmatmul.msk.bf16.gmra.mxu0 %vm340_vm1, %v1204_v24  ;;  %1125 = vmatmul.msk.bf16.gmra.mxu3 %vm340_vm1, %v1213_v25 }
  0x2a   :  { %132 = vperm.xlu1 %1237, %v74_v26  }
  0x2b   :  { %227 = vperm.xlu0 %1236, %v93_v27   ;;  %137 = vperm.xlu2 %1238, %v75_v28   ;;  %v800_v27 = vld [vmem:[%s1714_s6 + $0x48] sm:$0xff]  ;;  %v799_v28 = vld [vmem:[%s1714_s6 + $0x40] sm:$0xff] }
  0x32   :  { %217 = vperm.xlu1 %1237, %v91_v29   ;;  %v797_v29 = vld [vmem:[%s1714_s6 + $0x30] sm:$0xff] }
  0x33   :  { %212 = vperm.xlu0 %1236, %v90_v30   ;;  %122 = vperm.xlu2 %1238, %v72_v31  }
  0x39   :  { %1117 = vmatmul.msk.bf16.gmra.mxu0 %vm340_vm1, %v1205_v32  ;;  %1126 = vmatmul.msk.bf16.gmra.mxu3 %vm340_vm1, %v1214_v33 }
  0x3a   :  { %202 = vperm.xlu1 %1237, %v88_v34  }
  0x3b   :  { %127 = vperm.xlu0 %1236, %v73_v35   ;;  %207 = vperm.xlu2 %1238, %v89_v36   ;;  %v795_v35 = vld [vmem:[%s1714_s6 + $0x20] sm:$0xff]  ;;  %v798_v36 = vld [vmem:[%s1714_s6 + $0x38] sm:$0xff] }
  0x42   :  { %117 = vperm.xlu1 %1237, %v71_v37   ;;  %v796_v37 = vld [vmem:[%s1714_s6 + $0x28] sm:$0xff] }
  0x43   :  { %192 = vperm.xlu2 %1238, %v86_v38   ;;  %112 = vperm.xlu0 %1236, %v70_v39  }
  0x49   :  { %1118 = vmatmul.msk.bf16.gmra.mxu0 %vm340_vm1, %v1206_v40  ;;  %1127 = vmatmul.msk.bf16.gmra.mxu3 %vm340_vm1, %v1215_v41 }
  0x4a   :  { %102 = vperm.xlu1 %1237, %v68_v42  }
  0x4b   :  { %197 = vperm.xlu0 %1236, %v87_v43   ;;  %107 = vperm.xlu2 %1238, %v69_v44   ;;  %v794_v43 = vld [vmem:[%s1714_s6 + $0x18] sm:$0xff]  ;;  %v793_v44 = vld [vmem:[%s1714_s6 + $0x10] sm:$0xff] }
  0x52   :  { %187 = vperm.xlu1 %1237, %v85_v45   ;;  %v791_v45 = vld [vmem:[%s1714_s6] sm:$0xff] }
  0x53   :  { %182 = vperm.xlu0 %1236, %v84_v46   ;;  %602 = vperm.xlu2 %1238, %v560_v47  }
  0x59   :  { %1119 = vmatmul.msk.bf16.gmra.mxu0 %vm340_vm1, %v1207_v48  ;;  %1128 = vmatmul.msk.bf16.gmra.mxu3 %vm340_vm1, %v1216_v49 }
  0x5a   :  { %642 = vperm.xlu1 %1237, %v568_v50  }
  0x5b   :  { %607 = vperm.xlu0 %1236, %v561_v51   ;;  %647 = vperm.xlu2 %1238, %v569_v52   ;;  %v1026_v51 = vld [vmem:[%s1715_s8] sm:$0x3]  ;;  %v792_v52 = vld [vmem:[%s1714_s6 + $0x8] sm:$0xff] }
  0x5d   :  { %v1461_v56 = vpop.permute.xlu2 %162 }
  0x62   :  { %597 = vperm.xlu1 %1237, %v559_v53  }
  0x63   :  { %592 = vperm.xlu0 %1236, %v558_v54   ;;  %632 = vperm.xlu2 %1238, %v566_v55  }
  0x65   :  { %v1480_v62 = vpop.permute.xlu2 %167 }
  0x69   :  { %1120 = vmatmul.msk.bf16.gmra.mxu0 %vm340_vm1, %v1208_v57  ;;  %1129 = vmatmul.msk.bf16.gmra.mxu3 %vm340_vm1, %v1217_v58 }
  0x6a   :  { %582 = vperm.xlu1 %1237, %v556_v59  }
  0x6b   :  { %637 = vperm.xlu0 %1236, %v567_v60   ;;  %587 = vperm.xlu2 %1238, %v557_v61  }
  0x6d   :  { %v1493_v3 = vpop.permute.xlu2 %152 }
  0x72   :  { %627 = vperm.xlu1 %1237, %v565_v63  }
  0x73   :  { %622 = vperm.xlu0 %1236, %v564_v0   ;;  %572 = vperm.xlu2 %1238, %v554_v1  }
  0x74   :  { %v1491_v2 = vpop.permute.xlu1 %252 }
  0x75   :  { %v1495_v4 = vpop.permute.xlu0 %172  ;;  %v1514_v11 = vpop.permute.xlu2 %237 }
  0x79   :  { %1121 = vmatmul.msk.bf16.gmra.mxu0 %vm340_vm1, %v1209_v5 }
  0x7a   :  { %612 = vperm.xlu1 %1237, %v562_v6  }
  0x7b   :  { %577 = vperm.xlu0 %1236, %v555_v7   ;;  %617 = vperm.xlu2 %1238, %v563_v8  }
  0x7c   :  { %v1510_v9 = vpop.permute.xlu1 %257 }
  0x7d   :  { %v1512_v10 = vpop.permute.xlu0 %177  ;;  %v1543_v22 = vpop.permute.xlu2 %222 }
  0x82   :  { %884 = vperm.xlu1 %1237, %v806_v12  }
  0x83   :  { %879 = vperm.xlu0 %1236, %v805_v13   ;;  %869 = vperm.xlu2 %1238, %v803_v14  }
  0x84   :  { %v1525_v15 = vpop.permute.xlu1 %247 }
  0x85   :  { %v1527_v16 = vpop.permute.xlu0 %242  ;;  %v1561_v30 = vpop.permute.xlu2 %137 }
  0x86   :  { %v1532_v18 = vpop.f32.mrf.mxu0 }
  0x89   :  { %1122 = vmatmul.msk.bf16.gmra.mxu0 %vm340_vm1, %v1210_v17 }
  0x8a   :  { %859 = vperm.xlu1 %1237, %v801_v19  }
  0x8b   :  { %874 = vperm.xlu0 %1236, %v804_v20   ;;  %864 = vperm.xlu2 %1238, %v802_v21  }
  0x8c   :  { %v447_v23 = vpop.f32.mrf.mxu3  ;;  %v1546_v24 = vpop.permute.xlu1 %232 }
  0x8d   :  { %v1548_v25 = vpop.permute.xlu0 %157  ;;  %v123_v40 = vpop.permute.xlu2 %122 }
  0x8e   :  { %v1550_v26 = vpop.f32.mrf.mxu0 }
  0x92   :  { %854 = vperm.xlu1 %1237, %v800_v27  }
  0x93   :  { %849 = vperm.xlu0 %1236, %v799_v28   ;;  %839 = vperm.xlu2 %1238, %v797_v29  }
  0x94   :  { %v1563_v31 = vpop.f32.mrf.mxu3  ;;  %v1565_v32 = vpop.permute.xlu1 %147 }
  0x95   :  { %v1567_v33 = vpop.permute.xlu0 %142  ;;  %v208_v50 = vpop.permute.xlu2 %207 }
  0x96   :  { %v407_v34 = vpop.f32.mrf.mxu0 }
  0x9a   :  { %829 = vperm.xlu1 %1237, %v795_v35  }
  0x9b   :  { %844 = vperm.xlu0 %1236, %v798_v36   ;;  %834 = vperm.xlu2 %1238, %v796_v37  }
  0x9c   :  { %v452_v38 = vpop.f32.mrf.mxu3  ;;  %v133_v39 = vpop.permute.xlu1 %132 }
  0x9d   :  { %v1578_v41 = vpop.permute.xlu0 %227  ;;  %v193_v1 = vpop.permute.xlu2 %192 }
  0x9e   :  { %v409_v42 = vpop.f32.mrf.mxu0  ;;  %v448_v13 = vadd.f32 %v447_v23, %v193_v1 }
  0xa0   :  { %v500_v29 = vmax.f32 %v448_v13, 0.0 }
  0xa2   :  { %824 = vperm.xlu1 %1237, %v794_v43  }
  0xa3   :  { %819 = vperm.xlu0 %1236, %v793_v44   ;;  %809 = vperm.xlu2 %1238, %v791_v45  }
  0xa4   :  { %v454_v46 = vpop.f32.mrf.mxu3  ;;  %v218_v47 = vpop.permute.xlu1 %217 }
  0xa5   :  { %v213_v48 = vpop.permute.xlu0 %212  ;;  %v455_v57 = vadd.f32 %v454_v46, %v208_v50 }
  0xa6   :  { %v412_v49 = vpop.f32.mrf.mxu0 }
  0xa7   :  { %v413_v53 = vadd.f32 %v412_v49, %v123_v40  ;;  %v503_v5 = vmax.f32 %v455_v57, 0.0 }
  0xa9   :  { %v486_v61 = vmax.f32 %v413_v53, 0.0 }
  0xaa   :  { %1029 = vperm.xlu1 %1237, %v1026_v51  }
  0xab   :  { %814 = vperm.xlu0 %1236, %v792_v52  }
  0xac   :  { %v457_v54 = vpop.f32.mrf.mxu3  ;;  %v203_v55 = vpop.permute.xlu1 %202 }
  0xad   :  { %v453_v58 = vadd.f32 %v452_v38, %v203_v55  ;;  %v128_v59 = vpop.permute.xlu0 %127  ;;  %v458_v8 = vadd.f32 %v457_v54, %v213_v48 }
  0xae   :  { %v414_v60 = vpop.f32.mrf.mxu0 }
  0xaf   :  { %v502_v63 = vmax.f32 %v453_v58, 0.0  ;;  %v415_v0 = vadd.f32 %v414_v60, %v128_v59  ;;  %v504_v27 = vmax.f32 %v458_v8, 0.0 }
  0xb1   :  { %v1595_v6 = vmax.f32 %v486_v61, %v502_v63  ;;  %v487_v7 = vmax.f32 %v415_v0, 0.0 }
  0xb3   :  { %v1597_v12 = vmax.f32 %v487_v7, %v503_v5 }
  0xb4   :  { %v459_v14 = vpop.f32.mrf.mxu3  ;;  %v118_v36 = vpop.permute.xlu1 %117 }
  0xb5   :  { %v113_v17 = vpop.permute.xlu0 %112  ;;  %v548_v19 = vpack.c.bf16 %v1597_v12, %v1595_v6  ;;  %v410_v43 = vadd.f32 %v409_v42, %v118_v36  ;;  %v460_v23 = vadd.f32 %v459_v14, %v218_v47  ;;  %v1220_v6 = vld [vmem:[%s1716_s3 + $0x10] sm:$0xff]  ;;  %v1221_v12 = vld [vmem:[%s1716_s3 + $0x18] sm:$0xff] }
  0xb6   :  { %v408_v20 = vadd.f32 %v407_v34, %v113_v17  ;;  %v417_v21 = vpop.f32.mrf.mxu0 }
  0xb7   :  { %v418_v28 = vadd.f32 %v417_v21, %v133_v39  ;;  %v485_v49 = vmax.f32 %v410_v43, 0.0  ;;  %v505_v39 = vmax.f32 %v460_v23, 0.0 }
  0xb8   :  { %v484_v35 = vmax.f32 %v408_v20, 0.0 }
  0xb9   :  { %v488_v37 = vmax.f32 %v418_v28, 0.0 }
  0xba   :  { %v1601_v38 = vmax.f32 %v484_v35, %v500_v29 }
  0xbb   :  { %v1603_v40 = vmax.f32 %v488_v37, %v504_v27 }
  0xbc   :  { %v462_v44 = vpop.f32.mrf.mxu3 }
  0xbd   :  { %v198_v45 = vpop.permute.xlu0 %197  ;;  %v463_v53 = vadd.f32 %v462_v44, %v1543_v22 }
  0xbe   :  { %v450_v46 = vadd.f32 %v1563_v31, %v198_v45  ;;  %v419_v48 = vpop.f32.mrf.mxu0 }
  0xbf   :  { %v420_v34 = vadd.f32 %v419_v48, %v1561_v30  ;;  %v506_v57 = vmax.f32 %v463_v53, 0.0 }
  0xc0   :  { %v501_v50 = vmax.f32 %v450_v46, 0.0 }
  0xc1   :  { %v489_v51 = vmax.f32 %v420_v34, 0.0 }
  0xc2   :  { %v1607_v52 = vmax.f32 %v485_v49, %v501_v50 }
  0xc3   :  { %v1610_v54 = vmax.f32 %v489_v51, %v505_v39 }
  0xc4   :  { %v464_v55 = vpop.f32.mrf.mxu3  ;;  %v547_v42 = vpack.c.bf16 %v1607_v52, %v1601_v38  ;;  %v1223_v38 = vld [vmem:[%s1716_s3 + $0x28] sm:$0xff]  ;;  %v1225_v52 = vld [vmem:[%s1716_s3 + $0x38] sm:$0xff] }
  0xc5   :  { %v549_v31 = vpack.c.bf16 %v1610_v54, %v1603_v40  ;;  %v465_v53 = vadd.f32 %v464_v55, %v1578_v41  ;;  %v1224_v40 = vld [vmem:[%s1716_s3 + $0x30] sm:$0xff] }
  0xc6   :  { %v422_v47 = vpop.f32.mrf.mxu0 }
  0xc7   :  { %v423_v30 = vadd.f32 %v422_v47, %v1567_v33 }
  0xc9   :  { %v490_v58 = vmax.f32 %v423_v30, 0.0 }
  0xcb   :  { %v1617_v59 = vmax.f32 %v490_v58, %v506_v57 }
  0xcc   :  { %v467_v60 = vpop.f32.mrf.mxu3 }
  0xcd   :  { %v468_v49 = vadd.f32 %v467_v60, %v1546_v24  ;;  %v507_v24 = vmax.f32 %v465_v53, 0.0 }
  0xce   :  { %v424_v61 = vpop.f32.mrf.mxu0 }
  0xd4   :  { %v469_v63 = vpop.f32.mrf.mxu3 }
  0xd6   :  { %v427_v22 = vpop.f32.mrf.mxu0 }
  0xdc   :  { %v472_v0 = vpop.f32.mrf.mxu3 }
  0xdd   :  { %v473_v43 = vadd.f32 %v472_v0, %v1527_v16  ;;  %v183_v0 = vpop.permute.xlu0 %182 }
  0xde   :  { %v429_v1 = vpop.f32.mrf.mxu0 }
  0xdf   :  { %v430_v44 = vadd.f32 %v429_v1, %v1548_v25  ;;  %v510_v16 = vmax.f32 %v473_v43, 0.0 }
  0xe1   :  { %v493_v50 = vmax.f32 %v430_v44, 0.0 }
  0xe4   :  { %v474_v5 = vpop.f32.mrf.mxu3 }
  0xe5   :  { %v475_v29 = vadd.f32 %v474_v5, %v1525_v15 }
  0xe6   :  { %v432_v7 = vpop.f32.mrf.mxu0 }
  0xe7   :  { %v433_v35 = vadd.f32 %v432_v7, %v1461_v56  ;;  %v511_v46 = vmax.f32 %v475_v29, 0.0  ;;  %v103_v56 = vpop.permute.xlu1 %102 }
  0xe8   :  { %v403_v1 = vadd.f32 %v1532_v18, %v103_v56  ;;  %v1218_v18 = vld [vmem:[%s1716_s3] sm:$0xff] }
  0xe9   :  { %v494_v48 = vmax.f32 %v433_v35, 0.0 }
  0xeb   :  { %v526_v57 = vmax.f32 %v494_v48, %v510_v16 }
  0xec   :  { %v477_v13 = vpop.f32.mrf.mxu3 }
  0xed   :  { %v478_v21 = vadd.f32 %v477_v13, %v1491_v2 }
  0xee   :  { %v434_v8 = vpop.f32.mrf.mxu0 }
  0xef   :  { %v435_v33 = vadd.f32 %v434_v8, %v1480_v62  ;;  %v512_v23 = vmax.f32 %v478_v21, 0.0  ;;  %v470_v62 = vadd.f32 %v469_v63, %v1514_v11  ;;  %v188_v55 = vpop.permute.xlu1 %187 }
  0xf1   :  { %v509_v47 = vmax.f32 %v470_v62, 0.0 }
  0xf3   :  { %v525_v58 = vmax.f32 %v493_v50, %v509_v47 }
  0xf4   :  { %v479_v17 = vpop.f32.mrf.mxu3 }
  0xf5   :  { %v480_v27 = vadd.f32 %v479_v17, %v1510_v9  ;;  %v428_v9 = vadd.f32 %v427_v22, %v1493_v3  ;;  %v508_v3 = vmax.f32 %v468_v49, 0.0  ;;  %v108_v22 = vpop.permute.xlu2 %107  ;;  %v482_v17 = vmax.f32 %v403_v1, 0.0 }
  0xf6   :  { %v437_v14 = vpop.f32.mrf.mxu0 }
  0xf7   :  { %v438_v20 = vadd.f32 %v437_v14, %v1495_v4  ;;  %v495_v4 = vmax.f32 %v435_v33, 0.0  ;;  %v513_v45 = vmax.f32 %v480_v27, 0.0  ;;  %v492_v11 = vmax.f32 %v428_v9, 0.0  ;;  %v643_v29 = vpop.permute.xlu1 %642 }
  0xf9   :  { %v496_v36 = vmax.f32 %v438_v20, 0.0  ;;  %v527_v25 = vmax.f32 %v495_v4, %v511_v46  ;;  %v524_v60 = vmax.f32 %v492_v11, %v508_v3 }
  0xfb   :  { %v528_v15 = vmax.f32 %v496_v36, %v512_v23  ;;  %v552_v63 = vpack.c.bf16 %v527_v25, %v526_v57  ;;  %v551_v41 = vpack.c.bf16 %v525_v58, %v524_v60  ;;  %v608_v36 = vpop.permute.xlu0 %607 }
  0xfe   :  { %v439_v28 = vpop.f32.mrf.mxu0 }
  0xff   :  { %v440_v37 = vadd.f32 %v439_v28, %v1512_v10  ;;  %v425_v10 = vadd.f32 %v424_v61, %v1565_v32  ;;  %v405_v61 = vadd.f32 %v1550_v26, %v108_v22  ;;  %v1219_v26 = vld [vmem:[%s1716_s3 + $0x8] sm:$0xff]  ;;  %v598_v44 = vpop.permute.xlu1 %597 }
 0x101   :  { %v497_v2 = vmax.f32 %v440_v37, 0.0  ;;  %v491_v30 = vmax.f32 %v425_v10, 0.0  ;;  %v483_v14 = vmax.f32 %v405_v61, 0.0 }
 0x103   :  { %v529_v34 = vmax.f32 %v497_v2, %v513_v45  ;;  %v523_v5 = vmax.f32 %v491_v30, %v507_v24  ;;  %v593_v23 = vpop.permute.xlu0 %592 }
 0x105   :  { %v553_v39 = vpack.c.bf16 %v529_v34, %v528_v15  ;;  %v550_v21 = vpack.c.bf16 %v523_v5, %v1617_v59  ;;  %v603_v59 = vpop.permute.xlu2 %602 }
 0x106   :  { %v442_v51 = vpop.f32.mrf.mxu0 }
 0x107   :  { %698 = vmatpush.bf16.msra.mxu1 %v553_v39  ;;  %v443_v32 = vadd.f32 %v442_v51, %v183_v0  ;;  %v583_v2 = vpop.permute.xlu1 %582 }
 0x109   :  { %v498_v8 = vmax.f32 %v443_v32, 0.0 }
 0x10b   :  { %699 = vmatpush.bf16.msra.mxu1 %v552_v63  ;;  %v514_v33 = vmax.f32 %v482_v17, %v498_v8  ;;  %v638_v9 = vpop.permute.xlu0 %637 }
 0x10d   :  { %v648_v37 = vpop.permute.xlu2 %647 }
 0x10e   :  { %v444_v7 = vpop.f32.mrf.mxu0 }
 0x10f   :  { %v445_v13 = vadd.f32 %v444_v7, %v188_v55  ;;  %700 = vmatpush.bf16.msra.mxu1 %v551_v41  ;;  %v628_v48 = vpop.permute.xlu1 %627 }
 0x111   :  { %v499_v20 = vmax.f32 %v445_v13, 0.0 }
 0x113   :  { %v515_v27 = vmax.f32 %v483_v14, %v499_v20  ;;  %701 = vmatpush.bf16.msra.mxu1 %v550_v21  ;;  %v623_v34 = vpop.permute.xlu0 %622 }
 0x115   :  { %v546_v28 = vpack.c.bf16 %v515_v27, %v514_v33  ;;  %v633_v45 = vpop.permute.xlu2 %632 }
 0x117   :  { %702 = vmatpush.bf16.msra.mxu1 %v549_v31  ;;  %v613_v10 = vpop.permute.xlu1 %612 }
 0x11b   :  { %703 = vmatpush.bf16.msra.mxu1 %v548_v19  ;;  %v1222_v19 = vld [vmem:[%s1716_s3 + $0x20] sm:$0xff]  ;;  %v578_v53 = vpop.permute.xlu0 %577 }
 0x11d   :  { %v588_v46 = vpop.permute.xlu2 %587 }
 0x11f   :  { %704 = vmatpush.bf16.msra.mxu1 %v547_v42 }
 0x123   :  { %705 = vmatpush.bf16.msra.mxu1 %v546_v28 }
 0x125   :  { %v573_v56 = vpop.permute.xlu2 %572 }
 0x126   :  { %706 = vmatmul.bf16.vlgmr.msra.gmra.mxu1 %v1218_v18 }
 0x12d   :  { %v618_v11 = vpop.permute.xlu2 %617 }
 0x136   :  { %711 = vmatmul.bf16.gmra.mxu1 %v1219_v26 }
 0x146   :  { %716 = vmatmul.bf16.gmra.mxu1 %v1220_v6 }
 0x156   :  { %721 = vmatmul.bf16.gmra.mxu1 %v1221_v12 }
 0x166   :  { %726 = vmatmul.bf16.gmra.mxu1 %v1222_v19 }
 0x176   :  { %731 = vmatmul.bf16.gmra.mxu1 %v1223_v38 }
 0x186   :  { %736 = vmatmul.bf16.gmra.mxu1 %v1224_v40 }
 0x196   :  { %741 = vmatmul.bf16.gmra.mxu1 %v1225_v52 }
 0x1a3   :  { %v707_v54 = vpop.f32.mrf.mxu1 }
 0x1a4   :  { %v708_v49 = vadd.f32 %v707_v54, %v573_v56  ;;  %v870_v56 = vpop.permute.xlu2 %869 }
 0x1a6   :  { %v747_v25 = vmax.f32 %v708_v49, 0.0 }
 0x1ab   :  { %v709_v42 = vpop.f32.mrf.mxu1 }
 0x1ac   :  { %v710_v47 = vadd.f32 %v709_v42, %v578_v53 }
 0x1ae   :  { %v748_v30 = vmax.f32 %v710_v47, 0.0 }
 0x1b3   :  { %v712_v31 = vpop.f32.mrf.mxu1 }
 0x1b4   :  { %v713_v60 = vadd.f32 %v712_v31, %v583_v2 }
 0x1b6   :  { %v749_v41 = vmax.f32 %v713_v60, 0.0 }
 0x1bb   :  { %v714_v35 = vpop.f32.mrf.mxu1 }
 0x1bc   :  { %v715_v32 = vadd.f32 %v714_v35, %v588_v46 }
 0x1be   :  { %v750_v55 = vmax.f32 %v715_v32, 0.0 }
 0x1c3   :  { %v717_v43 = vpop.f32.mrf.mxu1 }
 0x1c4   :  { %v718_v21 = vadd.f32 %v717_v43, %v593_v23 }
 0x1c6   :  { %v751_v26 = vmax.f32 %v718_v21, 0.0 }
 0x1cb   :  { %v719_v4 = vpop.f32.mrf.mxu1 }
 0x1cc   :  { %v720_v33 = vadd.f32 %v719_v4, %v598_v44 }
 0x1ce   :  { %v752_v6 = vmax.f32 %v720_v33, 0.0 }
 0x1d3   :  { %v722_v62 = vpop.f32.mrf.mxu1 }
 0x1d4   :  { %v723_v42 = vadd.f32 %v722_v62, %v603_v59  ;;  %v1227_v59 = vld [vmem:[%s1717_s5 + $0x8] sm:$0xff] }
 0x1d5   :  { %v1231_v62 = vld [vmem:[%s1717_s5 + $0x28] sm:$0xff] }
 0x1db   :  { %v724_v15 = vpop.f32.mrf.mxu1 }
 0x1dc   :  { %v725_v31 = vadd.f32 %v724_v15, %v608_v36  ;;  %v1229_v36 = vld [vmem:[%s1717_s5 + $0x18] sm:$0xff]  ;;  %v880_v15 = vpop.permute.xlu0 %879 }
 0x1e3   :  { %v727_v16 = vpop.f32.mrf.mxu1 }
 0x1e4   :  { %v728_v50 = vadd.f32 %v727_v16, %v613_v10  ;;  %v875_v49 = vpop.permute.xlu0 %874  ;;  %v865_v10 = vpop.permute.xlu2 %864  ;;  %v1233_v16 = vld [vmem:[%s1717_s5 + $0x38] sm:$0xff] }
 0x1e6   :  { %v755_v39 = vmax.f32 %v728_v50, 0.0 }
 0x1e8   :  { %v763_v51 = vmax.f32 %v747_v25, %v755_v39  ;;  %v885_v25 = vpop.permute.xlu1 %884 }
 0x1eb   :  { %v729_v57 = vpop.f32.mrf.mxu1 }
 0x1ec   :  { %v730_v3 = vadd.f32 %v729_v57, %v618_v11  ;;  %v1700_v50 = vpop.permute.xlu0 %849  ;;  %v840_v39 = vpop.permute.xlu2 %839 }
 0x1ee   :  { %v756_v58 = vmax.f32 %v730_v3, 0.0 }
 0x1f0   :  { %v764_v63 = vmax.f32 %v748_v30, %v756_v58  ;;  %v860_v53 = vpop.permute.xlu1 %859 }
 0x1f2   :  { %v787_v22 = vpack.c.bf16 %v764_v63, %v763_v51 }
 0x1f3   :  { %v732_v0 = vpop.f32.mrf.mxu1 }
 0x1f4   :  { %v733_v24 = vadd.f32 %v732_v0, %v623_v34  ;;  %v1232_v34 = vld [vmem:[%s1717_s5 + $0x30] sm:$0xff]  ;;  %v845_v51 = vpop.permute.xlu0 %844  ;;  %v835_v47 = vpop.permute.xlu2 %834 }
 0x1f6   :  { %v757_v1 = vmax.f32 %v733_v24, 0.0 }
 0x1f8   :  { %v765_v8 = vmax.f32 %v749_v41, %v757_v1  ;;  %v855_v3 = vpop.permute.xlu1 %854 }
 0x1fb   :  { %v734_v61 = vpop.f32.mrf.mxu1 }
 0x1fc   :  { %v735_v5 = vadd.f32 %v734_v61, %v628_v48  ;;  %v753_v48 = vmax.f32 %v723_v42, 0.0  ;;  %v820_v11 = vpop.permute.xlu0 %819  ;;  %v810_v30 = vpop.permute.xlu2 %809 }
 0x1fe   :  { %v758_v7 = vmax.f32 %v735_v5, 0.0 }
 0x200   :  { %v766_v13 = vmax.f32 %v750_v55, %v758_v7  ;;  %v830_v61 = vpop.permute.xlu1 %829 }
 0x202   :  { %v788_v14 = vpack.c.bf16 %v766_v13, %v765_v8 }
 0x203   :  { %v737_v17 = vpop.f32.mrf.mxu1 }
 0x204   :  { %v738_v20 = vadd.f32 %v737_v17, %v633_v45  ;;  %v754_v45 = vmax.f32 %v725_v31, 0.0  ;;  %v815_v63 = vpop.permute.xlu0 %814 }
 0x206   :  { %v759_v28 = vmax.f32 %v738_v20, 0.0 }
 0x208   :  { %v767_v19 = vmax.f32 %v751_v26, %v759_v28  ;;  %v825_v41 = vpop.permute.xlu1 %824 }
 0x20b   :  { %v739_v27 = vpop.f32.mrf.mxu1 }
 0x20c   :  { %v740_v18 = vadd.f32 %v739_v27, %v638_v9  ;;  %v1226_v9 = vld [vmem:[%s1717_s5] sm:$0xff] }
 0x20e   :  { %v760_v12 = vmax.f32 %v740_v18, 0.0 }
 0x210   :  { %v768_v38 = vmax.f32 %v752_v6, %v760_v12 }
 0x212   :  { %v789_v40 = vpack.c.bf16 %v768_v38, %v767_v19 }
 0x213   :  { %v742_v52 = vpop.f32.mrf.mxu1 }
 0x214   :  { %v743_v54 = vadd.f32 %v742_v52, %v643_v29  ;;  %v1228_v29 = vld [vmem:[%s1717_s5 + $0x10] sm:$0xff] }
 0x216   :  { %v761_v2 = vmax.f32 %v743_v54, 0.0 }
 0x218   :  { %v769_v44 = vmax.f32 %v753_v48, %v761_v2 }
 0x21b   :  { %v744_v35 = vpop.f32.mrf.mxu1 }
 0x21c   :  { %v745_v46 = vadd.f32 %v744_v35, %v648_v37  ;;  %v1230_v37 = vld [vmem:[%s1717_s5 + $0x20] sm:$0xff] }
 0x21e   :  { %v762_v43 = vmax.f32 %v745_v46, 0.0 }
 0x220   :  { %v770_v23 = vmax.f32 %v754_v45, %v762_v43 }
 0x222   :  { %v790_v4 = vpack.c.bf16 %v770_v23, %v769_v44 }
 0x224   :  { %956 = vmatpush.bf16.msra.mxu2 %v790_v4 }
 0x228   :  { %957 = vmatpush.bf16.msra.mxu2 %v789_v40 }
 0x22c   :  { %958 = vmatpush.bf16.msra.mxu2 %v788_v14 }
 0x230   :  { %959 = vmatpush.bf16.msra.mxu2 %v787_v22 }
 0x233   :  { %1194 = vmatmul.msk.bf16.vlgmr.msra.gmra.mxu2 %vm927_vm2, %v1226_v9 }
 0x243   :  { %1195 = vmatmul.msk.bf16.gmra.mxu2 %vm927_vm2, %v1227_v59 }
 0x253   :  { %1196 = vmatmul.msk.bf16.gmra.mxu2 %vm927_vm2, %v1228_v29 }
 0x263   :  { %1197 = vmatmul.msk.bf16.gmra.mxu2 %vm927_vm2, %v1229_v36 }
 0x273   :  { %1198 = vmatmul.msk.bf16.gmra.mxu2 %vm927_vm2, %v1230_v37 }
 0x283   :  { %1199 = vmatmul.msk.bf16.gmra.mxu2 %vm927_vm2, %v1231_v62 }
 0x293   :  { %1200 = vmatmul.msk.bf16.gmra.mxu2 %vm927_vm2, %v1232_v34 }
 0x2a3   :  { %1201 = vmatmul.msk.bf16.gmra.mxu2 %vm927_vm2, %v1233_v16 }
 0x2b6   :  { %v961_v57 = vpop.f32.mrf.mxu2 }
 0x2b7   :  { %v962_v58 = vadd.f32 %v961_v57, %v810_v30 }
 0x2b9   :  { %v1001_v24 = vmax.f32 %v962_v58, 0.0 }
 0x2be   :  { %v963_v22 = vpop.f32.mrf.mxu2 }
 0x2bf   :  { %v964_v0 = vadd.f32 %v963_v22, %v815_v63 }
 0x2c1   :  { %v1002_v60 = vmax.f32 %v964_v0, 0.0 }
 0x2c3   :  { %v1018_v32 = vpack.c.bf16 %v1002_v60, %v1001_v24 }
 0x2c6   :  { %v966_v1 = vpop.f32.mrf.mxu2 }
 0x2c7   :  { %v967_v5 = vadd.f32 %v966_v1, %v820_v11 }
 0x2c9   :  { %v1003_v8 = vmax.f32 %v967_v5, 0.0 }
 0x2ce   :  { %v968_v55 = vpop.f32.mrf.mxu2 }
 0x2cf   :  { %v969_v7 = vadd.f32 %v968_v55, %v825_v41 }
 0x2d1   :  { %v1004_v13 = vmax.f32 %v969_v7, 0.0 }
 0x2d3   :  { %v1019_v14 = vpack.c.bf16 %v1004_v13, %v1003_v8 }
 0x2d6   :  { %v971_v17 = vpop.f32.mrf.mxu2 }
 0x2d7   :  { %v972_v20 = vadd.f32 %v971_v17, %v830_v61 }
 0x2d9   :  { %v1005_v27 = vmax.f32 %v972_v20, 0.0 }
 0x2de   :  { %v973_v21 = vpop.f32.mrf.mxu2 }
 0x2df   :  { %v974_v33 = vadd.f32 %v973_v21, %v835_v47 }
 0x2e1   :  { %v1006_v28 = vmax.f32 %v974_v33, 0.0 }
 0x2e3   :  { %v1020_v18 = vpack.c.bf16 %v1006_v28, %v1005_v27 }
 0x2e6   :  { %v976_v26 = vpop.f32.mrf.mxu2 }
 0x2e7   :  { %v977_v6 = vadd.f32 %v976_v26, %v840_v39 }
 0x2e9   :  { %v1007_v38 = vmax.f32 %v977_v6, 0.0 }
 0x2ee   :  { %v978_v12 = vpop.f32.mrf.mxu2 }
 0x2ef   :  { %v979_v19 = vadd.f32 %v978_v12, %v845_v51 }
 0x2f1   :  { %v1008_v40 = vmax.f32 %v979_v19, 0.0 }
 0x2f3   :  { %v1021_v52 = vpack.c.bf16 %v1008_v40, %v1007_v38 }
 0x2f6   :  { %v981_v54 = vpop.f32.mrf.mxu2 }
 0x2f7   :  { %v982_v47 = vadd.f32 %v981_v54, %v1700_v50 }
 0x2fe   :  { %v983_v42 = vpop.f32.mrf.mxu2 }
 0x2ff   :  { %v984_v16 = vadd.f32 %v983_v42, %v855_v3 }
 0x306   :  { %v986_v31 = vpop.f32.mrf.mxu2 }
 0x307   :  { %v987_v62 = vadd.f32 %v986_v31, %v860_v53 }
 0x309   :  { %v1011_v11 = vmax.f32 %v987_v62, 0.0 }
 0x30e   :  { %v988_v35 = vpop.f32.mrf.mxu2 }
 0x30f   :  { %v989_v29 = vadd.f32 %v988_v35, %v865_v10  ;;  %v1017_v10 = vld [vmem:[%s1718_s7] sm:$0x1] }
 0x311   :  { %v1012_v39 = vmax.f32 %v989_v29, 0.0 }
 0x313   :  { %v1023_v57 = vpack.c.bf16 %v1012_v39, %v1011_v11 }
 0x316   :  { %v991_v2 = vpop.f32.mrf.mxu2 }
 0x317   :  { %v992_v4 = vadd.f32 %v991_v2, %v870_v56 }
 0x319   :  { %v1013_v34 = vmax.f32 %v992_v4, 0.0 }
 0x31e   :  { %v993_v46 = vpop.f32.mrf.mxu2 }
 0x31f   :  { %v994_v44 = vadd.f32 %v993_v46, %v875_v49  ;;  %v1009_v49 = vmax.f32 %v982_v47, 0.0 }
 0x321   :  { %v1014_v36 = vmax.f32 %v994_v44, 0.0 }
 0x323   :  { %v1024_v51 = vpack.c.bf16 %v1014_v36, %v1013_v34 }
 0x326   :  { %v996_v48 = vpop.f32.mrf.mxu2 }
 0x327   :  { %v997_v45 = vadd.f32 %v996_v48, %v880_v15  ;;  %v1010_v15 = vmax.f32 %v984_v16, 0.0 }
 0x329   :  { %v1015_v9 = vmax.f32 %v997_v45, 0.0  ;;  %v1022_v56 = vpack.c.bf16 %v1010_v15, %v1009_v49 }
 0x32e   :  { %v998_v43 = vpop.f32.mrf.mxu2 }
 0x32f   :  { %v999_v23 = vadd.f32 %v998_v43, %v885_v25  ;;  %v1030_v25 = vpop.permute.xlu1 %1029 }
 0x331   :  { %v1016_v59 = vmax.f32 %v999_v23, 0.0 }
 0x333   :  { %v1025_v37 = vpack.c.bf16 %v1016_v59, %v1015_v9 }
 0x335   :  { %1032 = vmatpush.bf16.msrb.mxu3 %v1025_v37 }
 0x339   :  { %1033 = vmatpush.bf16.msrb.mxu3 %v1024_v51 }
 0x33d   :  { %1034 = vmatpush.bf16.msrb.mxu3 %v1023_v57 }
 0x341   :  { %1035 = vmatpush.bf16.msrb.mxu3 %v1022_v56 }
 0x345   :  { %1036 = vmatpush.bf16.msrb.mxu3 %v1021_v52 }
 0x349   :  { %1037 = vmatpush.bf16.msrb.mxu3 %v1020_v18 }
 0x34d   :  { %1038 = vmatpush.bf16.msrb.mxu3 %v1019_v14 }
 0x351   :  { %1039 = vmatpush.bf16.msrb.mxu3 %v1018_v32 }
 0x354   :  { %1040 = vmatmul.bf16.vlgmr.msrb.gmra.mxu3 %v1017_v10 }
 0x3d7   :  { %v1041_v53 = vpop.f32.mrf.mxu3 }
 0x3d8   :  { %v1042_v50 = vadd.f32 %v1041_v53, %v1030_v25 }
 0x3da   :  { %1045 = vst [vmem:[%s1719_s9] sm:$0x3] %v1042_v50 }
 0x3df   :  { %v1043_v3 = vpop.f32.mrf.mxu3 }

</bundles_post_ra>
